<compile_context>
chip_gen: v7x
topology: tpu7x:2x2x1
jax: 0.10.0
libtpu: 0.0.40
codegen_flags: <defaults>
</compile_context>

<pallas_src>
import functools

import jax
import jax.numpy as jnp
from jax.experimental import pallas as pl
from jax.experimental.pallas import tpu as pltpu

HID1, HID2 = 256, 128


def _round_up(x, m):
    return (x + m - 1) // m * m


def _bf16_activations():
    """bf16 tanh only on chips whose VPU/EUP support bf16 (v6e / v7x)."""
    try:
        kind = jax.devices()[0].device_kind.lower()
    except Exception:
        return False
    return ("v6" in kind) or ("v7" in kind)


_ACT_DTYPE = jnp.bfloat16 if _bf16_activations() else jnp.float32


# --------------------------------------------------------------------------
# Kernel: one batch tile of the full forward pass.
# --------------------------------------------------------------------------
def actor_critic_kernel(obs_ref, mask_ref,
                        w1_ref, b1_ref, w2_ref, b2_ref,
                        wa_ref, ba_ref, wc_ref, bc_ref, expand_ref,
                        logprob_ref, value_ref, *, act_dtype):
    obs = obs_ref[...].astype(jnp.bfloat16)                       # [TB, obs]

    # shared trunk: Linear -> Tanh -> Linear -> Tanh (bf16 weights, f32 acc;
    # tanh in bf16 on v6e/v7x, f32 elsewhere)
    h1 = jnp.tanh((jnp.dot(obs, w1_ref[...],
                           preferred_element_type=jnp.float32)
                   + b1_ref[...]).astype(act_dtype))              # [TB, 256]
    h2 = jnp.tanh((jnp.dot(h1.astype(jnp.bfloat16), w2_ref[...],
                           preferred_element_type=jnp.float32)
                   + b2_ref[...]).astype(act_dtype))              # [TB, 128]
    h2b = h2.astype(jnp.bfloat16)

    # actor head: lane-dense 128-wide slab (cols >= A have zero weight/bias
    # and get masked below)
    head = (jnp.dot(h2b, wa_ref[...], preferred_element_type=jnp.float32)
            + ba_ref[...])                                        # [TB, HP]

    # critic value: VPU multiply + lane reduce -> [TB, 1]  (4 B/row writeback)
    value_ref[...] = (jnp.sum(h2.astype(jnp.float32) * wc_ref[...],
                              axis=-1, keepdims=True)
                      + bc_ref[...])

    # expand the [TB, A] valid-action mask to the 128-lane head width on the
    # MXU (expand has eye(A) in cols 0..A-1, zeros in pad cols -> pads masked)
    mask_full = jnp.dot(mask_ref[...].astype(jnp.bfloat16), expand_ref[...],
                        preferred_element_type=jnp.float32)       # [TB, HP]
    logits = jnp.where(mask_full > 0.5, head, jnp.float32(-1.0e9))

    # Categorical(logits=...) -> normalized log-probs (stable log-softmax, f32)
    m = jnp.max(logits, axis=-1, keepdims=True)
    lse = m + jnp.log(jnp.sum(jnp.exp(logits - m), axis=-1, keepdims=True))
    logprob_ref[...] = (logits - lse).astype(logprob_ref.dtype)


# --------------------------------------------------------------------------
# Parameter packing: pad actor head to 128 lanes, bf16 weights, build the
# in-kernel mask-expansion matrix.
# --------------------------------------------------------------------------
def pack_params(params, action_size):
    A = action_size
    hp = _round_up(max(A, 1), 128)

    wa = jnp.zeros((HID2, hp), jnp.float32).at[:, :A].set(params["wa"])
    ba = jnp.zeros((1, hp), jnp.float32).at[0, :A].set(params["ba"])
    expand = jnp.zeros((A, hp), jnp.float32).at[:, :A].set(jnp.eye(A, dtype=jnp.float32))

    return dict(
        w1=params["w1"].astype(jnp.bfloat16),
        b1=params["b1"].reshape(1, -1).astype(jnp.float32),
        w2=params["w2"].astype(jnp.bfloat16),
        b2=params["b2"].reshape(1, -1).astype(jnp.float32),
        wa=wa.astype(jnp.bfloat16),
        ba=ba,
        wc=params["wc"].reshape(1, HID2).astype(jnp.float32),   # critic weight as a row
        bc=params["bc"].reshape(1, 1).astype(jnp.float32),
        expand=expand.astype(jnp.bfloat16),
        action_size=A,
        head_pad=hp,
    )


# --------------------------------------------------------------------------
# Batch tile selection.
# --------------------------------------------------------------------------
def _pick_tb(B):
    if B <= 256:
        return _round_up(max(B, 8), 8)            # single grid step
    # >= 2 grid steps so both v7x TensorCores get work; cap at 1024 rows
    tb = _round_up(-(-B // 2), 32)
    return min(1024, tb)


# --------------------------------------------------------------------------
# Wrapper
# --------------------------------------------------------------------------
def actor_critic_forward(obs, valid_actions_mask, packed, *,
                         logprob_dtype=jnp.float32):
    """Returns (log_probs[B, A], value[B, 1]).

    log_probs are the normalized Categorical logits (== torch dist.logits /
    dist.log_prob lookup table); value is the critic output.
    """
    obs = obs.astype(jnp.float32)
    B, obs_size = obs.shape
    A = packed["action_size"]
    hp = packed["head_pad"]

    mask_f = valid_actions_mask.astype(jnp.float32)               # [B, A]

    TB = _pick_tb(B)
    grid = (pl.cdiv(B, TB),)

    row = lambda i: (i, 0)     # batch-tiled arrays
    fixed = lambda i: (0, 0)   # weights/biases: VMEM-resident across grid steps

    in_specs = [
        pl.BlockSpec((TB, obs_size), row),
        pl.BlockSpec((TB, A), row),
        pl.BlockSpec(packed["w1"].shape, fixed),
        pl.BlockSpec(packed["b1"].shape, fixed),
        pl.BlockSpec(packed["w2"].shape, fixed),
        pl.BlockSpec(packed["b2"].shape, fixed),
        pl.BlockSpec(packed["wa"].shape, fixed),
        pl.BlockSpec(packed["ba"].shape, fixed),
        pl.BlockSpec(packed["wc"].shape, fixed),
        pl.BlockSpec(packed["bc"].shape, fixed),
        pl.BlockSpec(packed["expand"].shape, fixed),
    ]
    out_specs = (
        pl.BlockSpec((TB, hp), row),
        pl.BlockSpec((TB, 1), row),
    )
    out_shape = (
        jax.ShapeDtypeStruct((B, hp), logprob_dtype),   # log-probs (padded lanes)
        jax.ShapeDtypeStruct((B, 1), jnp.float32),      # critic value
    )

    logprob_p, value = pl.pallas_call(
        functools.partial(actor_critic_kernel, act_dtype=_ACT_DTYPE),
        out_shape=out_shape,
        grid=grid,
        in_specs=in_specs,
        out_specs=out_specs,
        compiler_params=pltpu.CompilerParams(
            dimension_semantics=("parallel",)),
    )(obs, mask_f,
      packed["w1"], packed["b1"], packed["w2"], packed["b2"],
      packed["wa"], packed["ba"], packed["wc"], packed["bc"], packed["expand"])

    return logprob_p[:, :A], value


# --------------------------------------------------------------------------
# Deterministic parameter init (PyTorch Linear default: U(-1/sqrt(in), 1/sqrt(in)))
# --------------------------------------------------------------------------
def init_params(key, obs_size, action_size):
    def linear(key, fan_in, fan_out):
        kw, kb = jax.random.split(key)
        bound = 1.0 / jnp.sqrt(fan_in)
        w = jax.random.uniform(kw, (fan_in, fan_out), jnp.float32, -bound, bound)
        b = jax.random.uniform(kb, (fan_out,), jnp.float32, -bound, bound)
        return w, b

    k1, k2, k3, k4 = jax.random.split(key, 4)
    w1, b1 = linear(k1, obs_size, HID1)
    w2, b2 = linear(k2, HID1, HID2)
    wa, ba = linear(k3, HID2, action_size)
    wc, bc = linear(k4, HID2, 1)
    return dict(w1=w1, b1=b1, w2=w2, b2=b2, wa=wa, ba=ba, wc=wc, bc=bc)


# --------------------------------------------------------------------------
# Pure-JAX reference mirroring the kernel's math (bf16 weights, f32 accumulate,
# same activation dtype as the kernel).
# --------------------------------------------------------------------------
def reference_forward(obs, mask, p, act_dtype):
    def mm(x, w):
        return jnp.dot(x.astype(jnp.bfloat16), w.astype(jnp.bfloat16),
                       preferred_element_type=jnp.float32)

    h = jnp.tanh((mm(obs, p["w1"]) + p["b1"]).astype(act_dtype))
    h = jnp.tanh((mm(h, p["w2"]) + p["b2"]).astype(act_dtype))
    logits = mm(h, p["wa"]) + p["ba"]
    logits = jnp.where(mask, logits, jnp.float32(-1.0e9))
    logprob = jax.nn.log_softmax(logits, axis=-1)
    value = jnp.dot(h.astype(jnp.float32), p["wc"].astype(jnp.float32)) + p["bc"]
    return logprob, value


def _check(obs, mask, params, packed, atol=1e-2, rtol=1e-2):
    logprob, value = actor_critic_forward(obs, mask, packed)
    jax.block_until_ready((logprob, value))
    r_logprob, r_value = reference_forward(obs, mask, params, _ACT_DTYPE)
    assert jnp.allclose(logprob, r_logprob, atol=atol, rtol=rtol), "log-prob mismatch"
    assert jnp.allclose(value, r_value, atol=atol, rtol=rtol), "value mismatch"


if __name__ == "__main__":
    OBS, ACT = 32, 16
    key = jax.random.PRNGKey(0)
    k_obs, k_mask, k_params, k_obs2, k_mask2 = jax.random.split(key, 5)

    params = init_params(k_params, OBS, ACT)
    packed = pack_params(params, ACT)

    # small batch (single grid step, tiny tile)
    B = 8
    obs = jax.random.normal(k_obs, (B, OBS), jnp.float32)
    mask = jax.random.bernoulli(k_mask, 0.7, (B, ACT))
    mask = mask.at[:, 0].set(True)          # guarantee at least one valid action
    _check(obs, mask, params, packed)

    # larger batch: exercises multi-step grid, ragged final block, resident weights
    B2 = 260
    obs2 = jax.random.normal(k_obs2, (B2, OBS), jnp.float32)
    mask2 = jax.random.bernoulli(k_mask2, 0.7, (B2, ACT))
    mask2 = mask2.at[:, 0].set(True)
    _check(obs2, mask2, params, packed)

    print("KERNEL_OK")
</pallas_src>

<mosaic_0001>
module attributes {stable_mosaic.version = 11 : i64} {
  func.func @actor_critic_kernel(%arg0: i32, %arg1: memref<8x32xf32, #tpu.memory_space<vmem>>, %arg2: memref<8x16xf32, #tpu.memory_space<vmem>>, %arg3: memref<32x256xbf16, #tpu.memory_space<vmem>>, %arg4: memref<1x256xf32, #tpu.memory_space<vmem>>, %arg5: memref<256x128xbf16, #tpu.memory_space<vmem>>, %arg6: memref<1x128xf32, #tpu.memory_space<vmem>>, %arg7: memref<128x128xbf16, #tpu.memory_space<vmem>>, %arg8: memref<1x128xf32, #tpu.memory_space<vmem>>, %arg9: memref<1x128xf32, #tpu.memory_space<vmem>>, %arg10: memref<1x1xf32, #tpu.memory_space<vmem>>, %arg11: memref<16x128xbf16, #tpu.memory_space<vmem>>, %arg12: memref<8x128xf32, #tpu.memory_space<vmem>>, %arg13: memref<8x1xf32, #tpu.memory_space<vmem>>) attributes {dimension_semantics = [#tpu.dimension_semantics<parallel>], iteration_bounds = array<i64: 1>, scalar_prefetch = 0 : i64, scratch_operands = 0 : i64, tpu.core_type = #tpu.core_type<tc>, window_params = [{transform_indices = @transform_0, window_bounds = array<i64: 8, 32>}, {transform_indices = @transform_1, window_bounds = array<i64: 8, 16>}, {pipeline_mode = #tpu.pipeline_mode<synchronous>, transform_indices = @transform_2, window_bounds = array<i64: 32, 256>}, {pipeline_mode = #tpu.pipeline_mode<synchronous>, transform_indices = @transform_3, window_bounds = array<i64: 1, 256>}, {pipeline_mode = #tpu.pipeline_mode<synchronous>, transform_indices = @transform_4, window_bounds = array<i64: 256, 128>}, {pipeline_mode = #tpu.pipeline_mode<synchronous>, transform_indices = @transform_5, window_bounds = array<i64: 1, 128>}, {pipeline_mode = #tpu.pipeline_mode<synchronous>, transform_indices = @transform_6, window_bounds = array<i64: 128, 128>}, {pipeline_mode = #tpu.pipeline_mode<synchronous>, transform_indices = @transform_7, window_bounds = array<i64: 1, 128>}, {pipeline_mode = #tpu.pipeline_mode<synchronous>, transform_indices = @transform_8, window_bounds = array<i64: 1, 128>}, {pipeline_mode = #tpu.pipeline_mode<synchronous>, transform_indices = @transform_9, window_bounds = array<i64: 1, 1>}, {pipeline_mode = #tpu.pipeline_mode<synchronous>, transform_indices = @transform_10, window_bounds = array<i64: 16, 128>}, {transform_indices = @transform_11, window_bounds = array<i64: 8, 128>}, {transform_indices = @transform_12, window_bounds = array<i64: 8, 1>}]} {
    %c0 = arith.constant 0 : index
    %c0_0 = arith.constant 0 : index
    %0 = vector.load %arg1[%c0, %c0_0] : memref<8x32xf32, #tpu.memory_space<vmem>>, vector<8x32xf32>
    %1 = arith.truncf %0 : vector<8x32xf32> to vector<8x32xbf16>
    %c0_1 = arith.constant 0 : index
    %c0_2 = arith.constant 0 : index
    %2 = vector.load %arg3[%c0_1, %c0_2] : memref<32x256xbf16, #tpu.memory_space<vmem>>, vector<32x256xbf16>
    %cst = arith.constant dense<0.000000e+00> : vector<8x256xf32>
    %3 = tpu.matmul %1, %2, %cst {dimension_numbers = #tpu.dot_dimension_numbers<[1], [0], [0], [1], [0, 0, 1, 1], [], []>} : vector<8x32xbf16>, vector<32x256xbf16>, vector<8x256xf32> -> vector<8x256xf32>
    %c0_3 = arith.constant 0 : index
    %c0_4 = arith.constant 0 : index
    %4 = vector.load %arg4[%c0_3, %c0_4] : memref<1x256xf32, #tpu.memory_space<vmem>>, vector<1x256xf32>
    %5 = vector.broadcast %4 : vector<1x256xf32> to vector<8x256xf32>
    %6 = arith.addf %3, %5 : vector<8x256xf32>
    %7 = math.tanh %6 : vector<8x256xf32>
    %8 = arith.truncf %7 : vector<8x256xf32> to vector<8x256xbf16>
    %c0_5 = arith.constant 0 : index
    %c0_6 = arith.constant 0 : index
    %9 = vector.load %arg5[%c0_5, %c0_6] : memref<256x128xbf16, #tpu.memory_space<vmem>>, vector<256x128xbf16>
    %cst_7 = arith.constant dense<0.000000e+00> : vector<8x128xf32>
    %10 = tpu.matmul %8, %9, %cst_7 {dimension_numbers = #tpu.dot_dimension_numbers<[1], [0], [0], [1], [0, 0, 1, 1], [], []>} : vector<8x256xbf16>, vector<256x128xbf16>, vector<8x128xf32> -> vector<8x128xf32>
    %c0_8 = arith.constant 0 : index
    %c0_9 = arith.constant 0 : index
    %11 = vector.load %arg6[%c0_8, %c0_9] : memref<1x128xf32, #tpu.memory_space<vmem>>, vector<1x128xf32>
    %12 = vector.broadcast %11 : vector<1x128xf32> to vector<8x128xf32>
    %13 = arith.addf %10, %12 : vector<8x128xf32>
    %14 = math.tanh %13 : vector<8x128xf32>
    %15 = arith.truncf %14 : vector<8x128xf32> to vector<8x128xbf16>
    %c0_10 = arith.constant 0 : index
    %c0_11 = arith.constant 0 : index
    %16 = vector.load %arg7[%c0_10, %c0_11] : memref<128x128xbf16, #tpu.memory_space<vmem>>, vector<128x128xbf16>
    %cst_12 = arith.constant dense<0.000000e+00> : vector<8x128xf32>
    %17 = tpu.matmul %15, %16, %cst_12 {dimension_numbers = #tpu.dot_dimension_numbers<[1], [0], [0], [1], [0, 0, 1, 1], [], []>} : vector<8x128xbf16>, vector<128x128xbf16>, vector<8x128xf32> -> vector<8x128xf32>
    %c0_13 = arith.constant 0 : index
    %c0_14 = arith.constant 0 : index
    %18 = vector.load %arg8[%c0_13, %c0_14] : memref<1x128xf32, #tpu.memory_space<vmem>>, vector<1x128xf32>
    %19 = vector.broadcast %18 : vector<1x128xf32> to vector<8x128xf32>
    %20 = arith.addf %17, %19 : vector<8x128xf32>
    %c0_15 = arith.constant 0 : index
    %c0_16 = arith.constant 0 : index
    %21 = vector.load %arg9[%c0_15, %c0_16] : memref<1x128xf32, #tpu.memory_space<vmem>>, vector<1x128xf32>
    %22 = vector.broadcast %21 : vector<1x128xf32> to vector<8x128xf32>
    %23 = arith.mulf %14, %22 : vector<8x128xf32>
    %cst_17 = arith.constant dense<0.000000e+00> : vector<8xf32>
    %24 = vector.multi_reduction <add>, %23, %cst_17 [1] : vector<8x128xf32> to vector<8xf32>
    %25 = vector.shape_cast %24 : vector<8xf32> to vector<8x1xf32>
    %c0_18 = arith.constant 0 : index
    %c0_19 = arith.constant 0 : index
    %26 = vector.load %arg10[%c0_18, %c0_19] : memref<1x1xf32, #tpu.memory_space<vmem>>, vector<1x1xf32>
    %27 = vector.broadcast %26 : vector<1x1xf32> to vector<8x1xf32>
    %28 = arith.addf %25, %27 : vector<8x1xf32>
    %c0_20 = arith.constant 0 : index
    %c0_21 = arith.constant 0 : index
    %29 = vector.load %arg13[%c0_20, %c0_21] : memref<8x1xf32, #tpu.memory_space<vmem>>, vector<8x1xf32>
    tpu.vector_store %arg13[%c0_20, %c0_21], %28 {strides = array<i32>} : memref<8x1xf32, #tpu.memory_space<vmem>>, vector<8x1xf32>,
    %c0_22 = arith.constant 0 : index
    %c0_23 = arith.constant 0 : index
    %30 = vector.load %arg2[%c0_22, %c0_23] : memref<8x16xf32, #tpu.memory_space<vmem>>, vector<8x16xf32>
    %31 = arith.truncf %30 : vector<8x16xf32> to vector<8x16xbf16>
    %c0_24 = arith.constant 0 : index
    %c0_25 = arith.constant 0 : index
    %32 = vector.load %arg11[%c0_24, %c0_25] : memref<16x128xbf16, #tpu.memory_space<vmem>>, vector<16x128xbf16>
    %cst_26 = arith.constant dense<0.000000e+00> : vector<8x128xf32>
    %33 = tpu.matmul %31, %32, %cst_26 {dimension_numbers = #tpu.dot_dimension_numbers<[1], [0], [0], [1], [0, 0, 1, 1], [], []>} : vector<8x16xbf16>, vector<16x128xbf16>, vector<8x128xf32> -> vector<8x128xf32>
    %cst_27 = arith.constant 5.000000e-01 : f32
    %34 = vector.broadcast %cst_27 : f32 to vector<8x128xf32>
    %35 = arith.cmpf ogt, %33, %34 : vector<8x128xf32>
    %cst_28 = arith.constant -1.000000e+09 : f32
    %36 = vector.broadcast %cst_28 : f32 to vector<8x128xf32>
    %37 = arith.select %35, %20, %36 : vector<8x128xi1>, vector<8x128xf32>
    %cst_29 = arith.constant dense<0xFF800000> : vector<8xf32>
    %38 = vector.multi_reduction <maximumf>, %37, %cst_29 [1] : vector<8x128xf32> to vector<8xf32>
    %39 = vector.shape_cast %38 : vector<8xf32> to vector<8x1xf32>
    %40 = vector.broadcast %39 : vector<8x1xf32> to vector<8x128xf32>
    %41 = arith.subf %37, %40 : vector<8x128xf32>
    %42 = math.exp %41 : vector<8x128xf32>
    %cst_30 = arith.constant dense<0.000000e+00> : vector<8xf32>
    %43 = vector.multi_reduction <add>, %42, %cst_30 [1] : vector<8x128xf32> to vector<8xf32>
    %44 = vector.shape_cast %43 : vector<8xf32> to vector<8x1xf32>
    %45 = math.log %44 : vector<8x1xf32>
    %46 = arith.addf %39, %45 : vector<8x1xf32>
    %47 = vector.broadcast %46 : vector<8x1xf32> to vector<8x128xf32>
    %48 = arith.subf %37, %47 : vector<8x128xf32>
    %c0_31 = arith.constant 0 : index
    %c0_32 = arith.constant 0 : index
    %49 = vector.load %arg12[%c0_31, %c0_32] : memref<8x128xf32, #tpu.memory_space<vmem>>, vector<8x128xf32>
    tpu.vector_store %arg12[%c0_31, %c0_32], %48 {strides = array<i32>} : memref<8x128xf32, #tpu.memory_space<vmem>>, vector<8x128xf32>,
    return
  }
  func.func @transform_0(%arg0: i32) -> (i32, i32) {
    %c0_i32 = arith.constant 0 : i32
    %c0_i32_0 = arith.constant 0 : i32
    return %arg0, %c0_i32 : i32, i32
  }
  func.func @transform_1(%arg0: i32) -> (i32, i32) {
    %c0_i32 = arith.constant 0 : i32
    %c0_i32_0 = arith.constant 0 : i32
    return %arg0, %c0_i32 : i32, i32
  }
  func.func @transform_2(%arg0: i32) -> (i32, i32) {
    %c0_i32 = arith.constant 0 : i32
    %c0_i32_0 = arith.constant 0 : i32
    %c0_i32_1 = arith.constant 0 : i32
    return %c0_i32, %c0_i32_0 : i32, i32
  }
  func.func @transform_3(%arg0: i32) -> (i32, i32) {
    %c0_i32 = arith.constant 0 : i32
    %c0_i32_0 = arith.constant 0 : i32
    %c0_i32_1 = arith.constant 0 : i32
    return %c0_i32, %c0_i32_0 : i32, i32
  }
  func.func @transform_4(%arg0: i32) -> (i32, i32) {
    %c0_i32 = arith.constant 0 : i32
    %c0_i32_0 = arith.constant 0 : i32
    %c0_i32_1 = arith.constant 0 : i32
    return %c0_i32, %c0_i32_0 : i32, i32
  }
  func.func @transform_5(%arg0: i32) -> (i32, i32) {
    %c0_i32 = arith.constant 0 : i32
    %c0_i32_0 = arith.constant 0 : i32
    %c0_i32_1 = arith.constant 0 : i32
    return %c0_i32, %c0_i32_0 : i32, i32
  }
  func.func @transform_6(%arg0: i32) -> (i32, i32) {
    %c0_i32 = arith.constant 0 : i32
    %c0_i32_0 = arith.constant 0 : i32
    %c0_i32_1 = arith.constant 0 : i32
    return %c0_i32, %c0_i32_0 : i32, i32
  }
  func.func @transform_7(%arg0: i32) -> (i32, i32) {
    %c0_i32 = arith.constant 0 : i32
    %c0_i32_0 = arith.constant 0 : i32
    %c0_i32_1 = arith.constant 0 : i32
    return %c0_i32, %c0_i32_0 : i32, i32
  }
  func.func @transform_8(%arg0: i32) -> (i32, i32) {
    %c0_i32 = arith.constant 0 : i32
    %c0_i32_0 = arith.constant 0 : i32
    %c0_i32_1 = arith.constant 0 : i32
    return %c0_i32, %c0_i32_0 : i32, i32
  }
  func.func @transform_9(%arg0: i32) -> (i32, i32) {
    %c0_i32 = arith.constant 0 : i32
    %c0_i32_0 = arith.constant 0 : i32
    %c0_i32_1 = arith.constant 0 : i32
    return %c0_i32, %c0_i32_0 : i32, i32
  }
  func.func @transform_10(%arg0: i32) -> (i32, i32) {
    %c0_i32 = arith.constant 0 : i32
    %c0_i32_0 = arith.constant 0 : i32
    %c0_i32_1 = arith.constant 0 : i32
    return %c0_i32, %c0_i32_0 : i32, i32
  }
  func.func @transform_11(%arg0: i32) -> (i32, i32) {
    %c0_i32 = arith.constant 0 : i32
    %c0_i32_0 = arith.constant 0 : i32
    return %arg0, %c0_i32 : i32, i32
  }
  func.func @transform_12(%arg0: i32) -> (i32, i32) {
    %c0_i32 = arith.constant 0 : i32
    %c0_i32_0 = arith.constant 0 : i32
    return %arg0, %c0_i32 : i32, i32
  }
}

</mosaic_0001>

<bundles_post_ra>
// kernel: tpu_custom_call.1
= control target key start
LH: loop header
LB: loop body
LE: loop exit
PB: predicated region body
PF: predicated region fallthrough
CT: control target
= control target key end

     0   :  { %s1071_s0 = inlined_call_operand.hbm [shape: f32[8,32], index: 0, kind: input, shape index: {}]   ;;  %s1072_s1 = inlined_call_operand.hbm [shape: f32[8,16], index: 1, kind: input, shape index: {}]   ;;  %s1073_s2 = inlined_call_operand.hbm [shape: bf16[32,256], index: 2, kind: input, shape index: {}]   ;;  %s1074_s3 = inlined_call_operand.vmem [shape: f32[1,256], index: 3, kind: input, shape index: {}]   ;;  %s1075_s4 = inlined_call_operand.hbm [shape: bf16[256,128], index: 4, kind: input, shape index: {}]   ;;  %s1076_s5 = inlined_call_operand.vmem [shape: f32[1,128], index: 5, kind: input, shape index: {}]   ;;  %s1077_s6 = inlined_call_operand.hbm [shape: bf16[128,128], index: 6, kind: input, shape index: {}]   ;;  %s1078_s7 = inlined_call_operand.vmem [shape: f32[1,128], index: 7, kind: input, shape index: {}]   ;;  %s1079_s8 = inlined_call_operand.vmem [shape: f32[1,128], index: 8, kind: input, shape index: {}]   ;;  %s1080_s9 = inlined_call_operand.<no memory space> [shape: f32[1,1], index: 9, kind: input, shape index: {}]   ;;  %s1081_s10 = inlined_call_operand.vmem [shape: bf16[16,128], index: 10, kind: input, shape index: {}]   ;;  %s1082_s11 = inlined_call_operand.hbm [shape: f32[8,128], index: 11, kind: output, shape index: {0}]   ;;  %s1083_s12 = inlined_call_operand.vmem [shape: f32[8,1], index: 12, kind: output, shape index: {1}]  }
   0x1   :  { %v18_v0 = vstv %s1080_s9 }
   0x2   :  { %19 = vst [vmem:[#allocation2] sm:$0x1] %v18_v0 }
   0x3   :  { %20 = vsyncpa [#allocation4], 0 }
   0x4   :  { %21 = vsyncpa [#allocation7], 0 }
   0x5   :  { %22 = vsyncpa [#allocation10], 0 }
   0x6   :  { %23 = vsyncpa [#allocation5], 0  ;;  %s880_s23 = smov [#allocation6]   ;;  %s881_s25 = smov [#allocation9]  }
   0x7   :  { %s40_s24 = sshll.u32 %s880_s23, 4  ;;  %s63_s26 = sshll.u32 %s881_s25, 4  ;;  %s41_s24 = int_to_ptr.vmem [resolvable:$true] %s40_s24  ;;  %s961_s26 = int_to_ptr.vmem [resolvable:$true] %s63_s26 }
   0x8   :  { %s740_s29 = scalar_lea.hbm %s1072_s1, 128 }
   0x9   :  { %p741_p0 = scmp.ne.s32.totalorder %s1072_s1, %s740_s29  ;;  %p744_p1 = scmp.lt.u32.totalorder %s740_s29, %s1072_s1 }
   0xb   :  { %p746_p2 = pnand %p744_p1, %p741_p0 }
   0xd   :  { %749 = shalt.err (!%p746_p2)
}
   0xe   :  { %s750_s15 = scalar_lea.vmem %s41_s24, 128  ;;  %p755_p4 = scmp.lt.s32.totalorder %s41_s24, %s41_s24 }
   0xf   :  { %p751_p3 = scmp.ne.s32.totalorder %s41_s24, %s750_s15  ;;  %p756_p5 = scmp.lt.s32.totalorder %s750_s15, %s750_s15 }
  0x11   :  { %p757_p6 = por %p756_p5, %p755_p4 }
  0x13   :  { %p758_p7 = pnand %p757_p6, %p751_p3 }
  0x15   :  { %761 = shalt.err (!%p758_p7)
}
  0x16   :  { %43 = dma.hbm_to_vmem [thread:$0]  %s1072_s1, 128, %s41_s24, [#allocation7]  }
  0x17   :  { %s762_s20 = scalar_lea.hbm %s1075_s4, 2048 }
  0x18   :  { %p763_p8 = scmp.ne.s32.totalorder %s1075_s4, %s762_s20  ;;  %p766_p9 = scmp.lt.u32.totalorder %s762_s20, %s1075_s4 }
  0x1a   :  { %p768_p10 = pnand %p766_p9, %p763_p8 }
  0x1c   :  { %771 = shalt.err (!%p768_p10)
}
  0x1d   :  { %s772_s27 = scalar_lea.vmem %s961_s26, 2048  ;;  %p777_p12 = scmp.lt.s32.totalorder %s961_s26, %s961_s26 }
  0x1e   :  { %p773_p11 = scmp.ne.s32.totalorder %s961_s26, %s772_s27  ;;  %p778_p13 = scmp.lt.s32.totalorder %s772_s27, %s772_s27 }
  0x20   :  { %p779_p0 = por %p778_p13, %p777_p12 }
  0x22   :  { %p780_p1 = pnand %p779_p0, %p773_p11 }
  0x24   :  { %783 = shalt.err (!%p780_p1)
}
  0x25   :  { %s882_s1 = smov 64   ;;  %s883_s24 = smov 4  }
  0x26   :  { %69 = dma.hbm_to_vmem [thread:$0]  %s1075_s4, 2048, %s961_s26, [#allocation10], %s882_s1, %s882_s1, %s883_s24  }
  0x27   :  { %s884_s30 = smov [#allocation3]   ;;  %s885_s9 = smov [#allocation8]  }
  0x28   :  { %s30_s13 = sshll.u32 %s884_s30, 4  ;;  %s49_s14 = sshll.u32 %s885_s9, 4  ;;  %s31_s13 = int_to_ptr.vmem [resolvable:$true] %s30_s13  ;;  %s995_s14 = int_to_ptr.vmem [resolvable:$true] %s49_s14 }
  0x29   :  { %s784_s17 = scalar_lea.hbm %s1071_s0, 128 }
  0x2a   :  { %p785_p2 = scmp.ne.s32.totalorder %s1071_s0, %s784_s17  ;;  %p788_p3 = scmp.lt.u32.totalorder %s784_s17, %s1071_s0 }
  0x2c   :  { %p790_p4 = pnand %p788_p3, %p785_p2 }
  0x2e   :  { %793 = shalt.err (!%p790_p4)
}
  0x2f   :  { %s794_s4 = scalar_lea.vmem %s31_s13, 128  ;;  %p799_p6 = scmp.lt.s32.totalorder %s31_s13, %s31_s13 }
  0x30   :  { %p795_p5 = scmp.ne.s32.totalorder %s31_s13, %s794_s4  ;;  %p800_p7 = scmp.lt.s32.totalorder %s794_s4, %s794_s4 }
  0x32   :  { %p801_p8 = por %p800_p7, %p799_p6 }
  0x34   :  { %p802_p9 = pnand %p801_p8, %p795_p5 }
  0x36   :  { %805 = shalt.err (!%p802_p9)
}
  0x37   :  { %33 = dma.hbm_to_vmem [thread:$0]  %s1071_s0, 128, %s31_s13, [#allocation4]  }
  0x38   :  { %s806_s27 = scalar_lea.hbm %s1073_s2, 512 }
  0x39   :  { %p807_p10 = scmp.ne.s32.totalorder %s1073_s2, %s806_s27  ;;  %p810_p11 = scmp.lt.u32.totalorder %s806_s27, %s1073_s2 }
  0x3b   :  { %p812_p12 = pnand %p810_p11, %p807_p10 }
  0x3d   :  { %815 = shalt.err (!%p812_p12)
}
  0x3e   :  { %s816_s15 = scalar_lea.vmem %s995_s14, 512  ;;  %p821_p0 = scmp.lt.s32.totalorder %s995_s14, %s995_s14 }
  0x3f   :  { %p817_p13 = scmp.ne.s32.totalorder %s995_s14, %s816_s15  ;;  %p822_p1 = scmp.lt.s32.totalorder %s816_s15, %s816_s15 }
  0x41   :  { %p823_p2 = por %p822_p1, %p821_p0 }
  0x43   :  { %p824_p3 = pnand %p823_p2, %p817_p13 }
  0x45   :  { %827 = shalt.err (!%p824_p3)
}
  0x46   :  { %s886_s0 = smov 128   ;;  %s887_s13 = smov 8  }
  0x47   :  { %55 = dma.hbm_to_vmem [thread:$0]  %s1073_s2, 512, %s995_s14, [#allocation7], %s886_s0, %s886_s0, %s887_s13  }
  0x48   :  { %s888_s18 = smov [#allocation11]   ;;  %s828_s4 = scalar_lea.hbm %s1077_s6, 1024 }
  0x49   :  { %s77_s19 = sshll.u32 %s888_s18, 4  ;;  %p829_p4 = scmp.ne.s32.totalorder %s1077_s6, %s828_s4  ;;  %s78_s19 = int_to_ptr.vmem [resolvable:$true] %s77_s19 }
  0x4a   :  { %p832_p5 = scmp.lt.u32.totalorder %s828_s4, %s1077_s6 }
  0x4c   :  { %p834_p6 = pnand %p832_p5, %p829_p4 }
  0x4e   :  { %837 = shalt.err (!%p834_p6)
}
  0x4f   :  { %s838_s27 = scalar_lea.vmem %s78_s19, 1024  ;;  %p843_p8 = scmp.lt.s32.totalorder %s78_s19, %s78_s19 }
  0x50   :  { %p839_p7 = scmp.ne.s32.totalorder %s78_s19, %s838_s27  ;;  %p844_p9 = scmp.lt.s32.totalorder %s838_s27, %s838_s27 }
  0x52   :  { %p845_p10 = por %p844_p9, %p843_p8 }
  0x54   :  { %p846_p11 = pnand %p845_p10, %p839_p7 }
  0x56   :  { %849 = shalt.err (!%p846_p11)
}
  0x57   :  { %83 = dma.hbm_to_vmem [thread:$0]  %s1077_s6, 1024, %s78_s19, [#allocation10], %s882_s1, %s882_s1, %s883_s24  }
  0x58   :  { %872 = dma.done.wait [#allocation4], 128  }
  0x59   :  { %873 = vsyncadd [#allocation4], 4294967168 }
  0x5a   :  { %874 = dma.done.wait [#allocation7], 640  }
  0x5b   :  { %875 = vsyncadd [#allocation7], 4294966656 }
  0x5c   :  { %876 = dma.done.wait [#allocation10], 3072  }
  0x5d   :  { %877 = vsyncadd [#allocation10], 4294964224  ;;  %v889_v1 = vmov 0   ;;  %v699_v2 = vld [vmem:[#allocation8 + $0x4] ss:$8 sps:$4 sm:$0xff]   ;;  %v108_v6 = vld [vmem:[#allocation3] sm:$0xff]  ;;  %v116_v28 = vlaneseq }
  0x5e   :  { %182 = vmatprep.mubr.bf16.mxu0 %v889_v1  ;;  %v701_v3 = vld [vmem:[#allocation8] ss:$8 sps:$4 sm:$0xff]   ;;  %150 = vmatprep.subr.bf16.mxu0 %v699_v2  ;;  %v702_v4 = vld [vmem:[#allocation8 + $0x14] ss:$8 sps:$4 sm:$0xff]   ;;  %v704_v5 = vld [vmem:[#allocation8 + $0x10] ss:$8 sps:$4 sm:$0xff]   ;;  %v109_v10 = vpack.c.bf16 %v108_v6, %v108_v6 }
  0x5f   :  { %151 = vmatpush1.bf16.msra.mxu0 %v701_v3  ;;  %v705_v7 = vld [vmem:[#allocation9 + $0x40] sm:$0xff]   ;;  %v707_v9 = vld [vmem:[#allocation9 + $0x48] sm:$0xff]   ;;  %vm146_vm0 = vcmask 261120   ;;  %v709_v12 = vld [vmem:[#allocation9 + $0x50] sm:$0xff]   ;;  %v890_v25 = vmov 0.0   ;;  %v117_v29 = vshrl.u32 %v116_v28, 7 }
  0x60   :  { %152 = vmatprep.subr.bf16.mxu0 %v702_v4  ;;  %v706_v8 = vld [vmem:[#allocation9] sm:$0xff]   ;;  %627 = vmatprep.subr.bf16.mxu1 %v705_v7  ;;  %v708_v11 = vld [vmem:[#allocation9 + $0x8] sm:$0xff]   ;;  %v710_v13 = vld [vmem:[#allocation9 + $0x10] sm:$0xff]   ;;  %vm891_vm1 = vmmov 0   ;;  %vm513_vm2 = vcmask 130048   ;;  %vm501_vm3 = vcmask 7168  }
  0x61   :  { %628 = vmatpush3.bf16.msra.mxu1 %v706_v8  ;;  %v711_v14 = vld [vmem:[#allocation9 + $0x58] sm:$0xff]   ;;  %v713_v16 = vld [vmem:[#allocation9 + $0x60] sm:$0xff]   ;;  %v715_v18 = vld [vmem:[#allocation9 + $0x68] sm:$0xff]   ;;  %v118_v30 = vsub.s32 0, %v117_v29  ;;  %v122_v32 = vsub.s32 1, %v117_v29 }
  0x62   :  { %629 = vmatprep.subr.bf16.mxu1 %v707_v9  ;;  %v712_v15 = vld [vmem:[#allocation9 + $0x18] sm:$0xff]   ;;  %v714_v17 = vld [vmem:[#allocation9 + $0x20] sm:$0xff]   ;;  %v716_v19 = vld [vmem:[#allocation9 + $0x28] sm:$0xff]  }
  0x63   :  { %153 = vmatpush1.bf16.msra.mxu0 %v704_v5  ;;  %v717_v20 = vld [vmem:[#allocation9 + $0x70] sm:$0xff]   ;;  %v719_v22 = vld [vmem:[#allocation9 + $0x78] sm:$0xff]   ;;  %v721_v24 = vld [vmem:[#allocation11] sm:$0xff]  }
  0x64   :  { %v718_v21 = vld [vmem:[#allocation9 + $0x30] sm:$0xff]   ;;  %v720_v23 = vld [vmem:[#allocation9 + $0x38] sm:$0xff]   ;;  %660 = vmatprep.subr.bf16.mxu0 %v890_v25  ;;  %v722_v26 = vld [vmem:[#allocation11 + $0x8] sm:$0xff]  }
  0x65   :  { %630 = vmatpush3.bf16.msra.mxu1 %v708_v11  ;;  %v723_v27 = vld [vmem:[#allocation11 + $0x10] sm:$0xff]   ;;  %v724_v45 = vld [vmem:[#allocation11 + $0x18] sm:$0xff]   ;;  %v725_v46 = vld [vmem:[#allocation11 + $0x20] sm:$0xff]  }
  0x66   :  { %596 = vmatmul.mubr.msk.bf16.vlgmr.msra.gmra.mrb[0].mxu0 %vm146_vm0, %v109_v10  ;;  %631 = vmatprep.subr.bf16.mxu1 %v709_v12  ;;  %v114_v31 = vld [vmem:[%s1074_s3] sm:$0x3]  ;;  %v503_v49 = vld [vmem:[#allocation6] sm:$0xff] }
  0x67   :  { %661 = vmatpush3.bf16.msra.mxu0 %v721_v24  ;;  %v119_v33 = vrot.slane %v114_v31, %v118_v30  ;;  %v123_v34 = vrot.slane %v114_v31, %v122_v32  ;;  %v726_v47 = vld [vmem:[#allocation11 + $0x28] sm:$0xff]   ;;  %676 = vmatprep.mubr.msk.bf16.mxu0 %vm891_vm1, %v890_v25  ;;  %v727_v50 = vld [vmem:[#allocation11 + $0x30] sm:$0xff]   ;;  %v504_v51 = vpack.c.bf16 %v503_v49, %v503_v49  ;;  %v729_v52 = vld [vmem:[#allocation11 + $0x38] sm:$0xff]  }
  0x68   :  { %662 = vmatprep.subr.bf16.mxu0 %v890_v25  ;;  %v728_v48 = vld [vmem:[%s1081_s10] sm:$0xff]  }
  0x69   :  { %632 = vmatpush3.bf16.msra.mxu1 %v710_v13  ;;  %v597_v54 = vld [vmem:[%s1076_s5] ss:$0 sm:$0xff] }
  0x6a   :  { %633 = vmatprep.subr.bf16.mxu1 %v711_v14  ;;  %v623_v60 = vld [vmem:[%s1079_s8] ss:$0 sm:$0xff]  ;;  %s892_s8 = smov [#allocation12]  }
  0x6b   :  { %663 = vmatpush3.bf16.msra.mxu0 %v722_v26  ;;  %v624_v4 = vld [vmem:[#allocation2] ss:$0 sm:$0xff] }
  0x6c   :  { %664 = vmatprep.subr.bf16.mxu0 %v890_v25  ;;  %v614_v7 = vld [vmem:[%s1078_s7] ss:$0 sm:$0xff]  ;;  %s577_s7 = sshll.u32 %s892_s8, 4  ;;  %s578_s7 = int_to_ptr.vmem [resolvable:$true] %s577_s7 }
  0x6d   :  { %634 = vmatpush3.bf16.msra.mxu1 %v712_v15  ;;  %p855_p13 = scmp.lt.s32.totalorder %s578_s7, %s578_s7 }
  0x6e   :  { %635 = vmatprep.subr.bf16.mxu1 %v713_v16 }
  0x6f   :  { %665 = vmatpush3.bf16.msra.mxu0 %v723_v27 }
  0x70   :  { %666 = vmatprep.subr.bf16.mxu0 %v890_v25 }
  0x71   :  { %636 = vmatpush3.bf16.msra.mxu1 %v714_v17 }
  0x72   :  { %637 = vmatprep.subr.bf16.mxu1 %v715_v18 }
  0x73   :  { %667 = vmatpush3.bf16.msra.mxu0 %v724_v45 }
  0x74   :  { %668 = vmatprep.subr.bf16.mxu0 %v890_v25 }
  0x75   :  { %638 = vmatpush3.bf16.msra.mxu1 %v716_v19 }
  0x76   :  { %639 = vmatprep.subr.bf16.mxu1 %v717_v20 }
  0x77   :  { %669 = vmatpush3.bf16.msra.mxu0 %v725_v46 }
  0x78   :  { %670 = vmatprep.subr.bf16.mxu0 %v890_v25 }
  0x79   :  { %640 = vmatpush3.bf16.msra.mxu1 %v718_v21 }
  0x7a   :  { %641 = vmatprep.subr.bf16.mxu1 %v719_v22 }
  0x7b   :  { %671 = vmatpush3.bf16.msra.mxu0 %v726_v47 }
  0x7c   :  { %672 = vmatprep.subr.bf16.mxu0 %v890_v25 }
  0x7d   :  { %642 = vmatpush3.bf16.msra.mxu1 %v720_v23 }
  0x7e   :  { %680 = vmatprep.subr.bf16.mxu1 %v890_v25 }
  0x7f   :  { %673 = vmatpush3.bf16.msra.mxu0 %v727_v50 }
  0x80   :  { %674 = vmatprep.subr.bf16.mxu0 %v890_v25 }
  0x83   :  { %675 = vmatpush3.bf16.msra.mxu0 %v729_v52 }
 0x139   :  { %v184_v35 = vpop.f32.mrb[0].mxu0 }
 0x13a   :  { %v185_v36 = vadd.f32 %v184_v35, %v119_v33  ;;  %v186_v37 = vpop.f32.mrb[1].mxu0 }
 0x13b   :  { %v187_v38 = vadd.f32 %v186_v37, %v123_v34  ;;  %v188_v39 = vpop.f32.mrb[2].mxu0 }
 0x13c   :  { %730 = vtanh.f32 %v185_v36  ;;  %v189_v40 = vpop.f32.mrb[3].mxu0 }
 0x13d   :  { %732 = vtanh.f32 %v187_v38 }
 0x146   :  { %v731_v41 = vpop.eup %730 }
 0x147   :  { %v733_v42 = vpop.eup %732  ;;  %v193_v44 = vpack.c.bf16 %v731_v41, %v731_v41 }
 0x148   :  { %v194_v43 = vpack.c.bf16 %v733_v42, %v733_v42 }
 0x14a   :  { %362 = vmatprep.mubr.bf16.mxu1 %v194_v43 }
 0x14b   :  { %363 = vmatmul.mubr.bf16.vlgmr.msra.gmra.mrb[0].mxu1 %v193_v44 }
 0x14c   :  { %682 = vmatprep.mubr.msk.bf16.mxu1 %vm891_vm1, %v890_v25  ;;  %681 = vmatpush3.bf16.msra.mxu1 %v728_v48 }
 0x153   :  { %683 = vmatmul.mubr.msk.bf16.vlgmr.msra.gmra.mrb[4].mxu1 %vm513_vm2, %v504_v51 }
 0x21e   :  { %v643_v53 = vpop.f32.mrb[0].mxu1 }
 0x21f   :  { %v644_v55 = vpop.f32.mrb[1].mxu1 }
 0x220   :  { %v645_v56 = vadd.f32 %v644_v55, %v643_v53  ;;  %v646_v57 = vpop.f32.mrb[2].mxu1 }
 0x221   :  { %v647_v58 = vpop.f32.mrb[3].mxu1 }
 0x222   :  { %v365_v59 = vadd.f32 %v645_v56, %v597_v54 }
 0x224   :  { %734 = vtanh.f32 %v365_v59 }
 0x226   :  { %v551_v0 = vpop.f32.mrb[4].mxu1 }
 0x227   :  { %v684_v1 = vpop.f32.mrb[5].mxu1  ;;  %vm557_vm4 = vcmp.gt.f32.partialorder %v551_v0, 0.5 }
 0x228   :  { %v554_v2 = vpop.f32.mrb[6].mxu1 }
 0x229   :  { %v685_v3 = vpop.f32.mrb[7].mxu1 }
 0x22e   :  { %v735_v61 = vpop.eup %734 }
 0x22f   :  { %v490_v62 = vmul.f32 %v735_v61, %v623_v60  ;;  %v371_v63 = vpack.c.bf16 %v735_v61, %v735_v61 }
 0x231   :  { %491 = vadd.xlane.f32.xlu1 %v490_v62  ;;  %677 = vmatmul.mubr.bf16.vlgmr.msra.gmra.mrb[4].mxu0 %v371_v63 }
 0x2be   :  { %v492_v5 = vpop.xlane.xlu1 %491 }
 0x2bf   :  { %v500_v6 = vadd.f32 %v624_v4, %v492_v5 }
 0x2c1   :  { %502 = vst.msk [vmem:[%s1083_s12] sm:$0xff] %vm501_vm3, %v500_v6  ;;  %s850_s12 = scalar_lea.vmem %s578_s7, 128 }
 0x2c2   :  { %p851_p12 = scmp.ne.s32.totalorder %s578_s7, %s850_s12  ;;  %p856_p0 = scmp.lt.s32.totalorder %s850_s12, %s850_s12 }
 0x2c4   :  { %p857_p1 = por %p856_p0, %p855_p13 }
 0x2c6   :  { %p858_p2 = pnand %p857_p1, %p851_p12 }
 0x304   :  { %v477_v8 = vpop.f32.mrb[4].mxu0 }
 0x305   :  { %v478_v9 = vadd.f32 %v614_v7, %v477_v8  ;;  %v678_v10 = vpop.f32.mrb[5].mxu0 }
 0x306   :  { %v480_v11 = vpop.f32.mrb[6].mxu0 }
 0x307   :  { %v679_v12 = vpop.f32.mrb[7].mxu0  ;;  %v558_v13 = vsel %vm557_vm4, %v478_v9, -1e+09 }
 0x308   :  { %559 = vmax.xlane.f32.xlu0 %v558_v13 }
 0x395   :  { %v560_v14 = vpop.xlane.xlu0 %559 }
 0x396   :  { %v561_v15 = vsub.f32 %v558_v13, %v560_v14 }
 0x398   :  { %v562_v16 = vmul.f32 1.442695, %v561_v15 }
 0x39a   :  { %736 = vpow2.f32 %v562_v16 }
 0x3a4   :  { %v737_v17 = vpop.eup %736 }
 0x3a5   :  { %564 = vadd.xlane.f32.xlu0 %v737_v17 }
 0x432   :  { %v565_v18 = vpop.xlane.xlu0 %564 }
 0x433   :  { %738 = vlog2.f32 %v565_v18 }
 0x43d   :  { %v739_v19 = vpop.eup %738 }
 0x43e   :  { %v567_v20 = vmul.f32 0.6931472, %v739_v19 }
 0x440   :  { %v568_v21 = vadd.f32 %v567_v20, %v560_v14 }
 0x442   :  { %v569_v22 = vsub.f32 %v558_v13, %v568_v21 }
 0x444   :  { %570 = vst [vmem:[#allocation12] sm:$0xff] %v569_v22 }
 0x445   :  { %861 = shalt.err (!%p858_p2)
}
 0x446   :  { %s862_s17 = scalar_lea.hbm %s1082_s11, 128 }
 0x447   :  { %p863_p3 = scmp.ne.s32.totalorder %s1082_s11, %s862_s17  ;;  %p866_p4 = scmp.lt.u32.totalorder %s862_s17, %s1082_s11 }
 0x449   :  { %p868_p5 = pnand %p866_p4, %p863_p3 }
 0x44b   :  { %871 = shalt.err (!%p868_p5)
}
 0x44c   :  { %580 = dma.vmem_to_hbm [thread:$0]  %s578_s7, 128, %s1082_s11, [#allocation5]  }
 0x44d   :  { %878 = dma.done.wait [#allocation5], 128  }
 0x44e   :  { %879 = vsyncadd [#allocation5], 4294967168 }
 0x44f   :  { %588 = vsyncpa [#allocation4], 1 }
 0x450   :  { %589 = vsyncpa [#allocation7], 1 }
 0x451   :  { %590 = vsyncpa [#allocation10], 1 }
 0x452   :  { %591 = vsyncpa [#allocation5], 1 }

</bundles_post_ra>
